<compile_context>
chip_gen: v7x
topology: tpu7x:2x2x1
jax: 0.10.0
libtpu: 0.0.40
codegen_flags: <defaults>
</compile_context>

<pallas_src>
import jax
import jax.numpy as jnp
from jax.experimental import pallas as pl
from jax.experimental.pallas import tpu as pltpu

INPUT_DIM = 10
H1 = 64
H2 = 32
OUT = 1

# With double-buffered (tile, 10)->(tile, 128)-padded f32 x blocks, the padded
# (tile, 1) output blocks and the (tile, 128)-lane f32 intermediates, a 2048-row
# tile stays comfortably under the scoped-VMEM limits of v5e/v6e/v7x while being
# large enough (~1 MiB in / ~1 MiB out per step) to amortize the ~0.35 us
# per-grid-step overhead.
DEFAULT_TILE_B = 2048


def _mlp_kernel(x_ref, w1_ref, b1_ref, w2_ref, b2_ref, w3_ref, b3_ref, o_ref):
    # Layer 1: (tile, 10) @ (10, 64) on the MXU, f32 accumulate.
    h1 = jnp.dot(x_ref[...], w1_ref[...],
                 preferred_element_type=jnp.float32) + b1_ref[...]
    h1 = jnp.maximum(h1, 0.0)                                   # ReLU (VPU)

    # Layer 2: (tile, 64) @ (64, 32) on the MXU, f32 accumulate.
    h2 = jnp.dot(h1, w2_ref[...],
                 preferred_element_type=jnp.float32) + b2_ref[...]
    h2 = jnp.maximum(h2, 0.0)                                   # ReLU (VPU)

    # Layer 3 (32 -> 1): off the MXU.  w3 is a lane-dense (1, 32) row; a VPU
    # broadcast-multiply + XLU lane reduce replaces a <1%-utilized MXU matmul.
    y = jnp.sum(h2 * w3_ref[...], axis=-1, keepdims=True) + b3_ref[...]
    o_ref[...] = y.astype(o_ref.dtype)                          # (tile, 1)


def regression_nn_forward(x, params, tile_b=DEFAULT_TILE_B):
    """Forward pass of RegressionNN via a single fused, batch-tiled Pallas kernel.

    x: (B, INPUT_DIM) float32
    params: dict with w1 (10,64), b1 (1,64), w2 (64,32), b2 (1,32),
            w3 (1,32)  [lane-dense row == torch W3 of shape (out,in)], b3 (1,1)
    returns: (B, 1) float32
    """
    B = x.shape[0]
    w1, b1 = params["w1"], params["b1"]
    w2, b2 = params["w2"], params["b2"]
    w3, b3 = params["w3"], params["b3"]

    # Batch tiling: either one block covering the whole batch (block dim equals
    # the full array dim -> no (8,128) constraint, no edge handling), or
    # tile_b-row blocks with a masked partial last block.  No pad/slice copies.
    tile = B if B <= tile_b else tile_b
    grid = (pl.cdiv(B, tile),)

    # Weights/biases: full-array blocks with constant index maps -> DMA'd once,
    # resident in VMEM across all grid steps.
    const = lambda a: pl.BlockSpec(a.shape, lambda i: (0,) * a.ndim)

    return pl.pallas_call(
        _mlp_kernel,
        out_shape=jax.ShapeDtypeStruct((B, OUT), jnp.float32),
        grid=grid,
        in_specs=[
            pl.BlockSpec((tile, INPUT_DIM), lambda i: (i, 0)),   # x: tiled on batch
            const(w1), const(b1),
            const(w2), const(b2),
            const(w3), const(b3),
        ],
        out_specs=pl.BlockSpec((tile, OUT), lambda i: (i, 0)),
        compiler_params=pltpu.CompilerParams(
            dimension_semantics=("parallel",),          # megacore-shard the batch axis
            vmem_limit_bytes=32 * 1024 * 1024,          # safe on v5e/v6e/v7x
        ),
    )(x, w1, b1, w2, b2, w3, b3)


def init_params(key):
    """Deterministic parameter init (Kaiming-uniform-ish like torch defaults)."""
    k = jax.random.split(key, 6)

    def linear(kw, kb, fan_in, fan_out):
        bound = 1.0 / jnp.sqrt(fan_in)
        w = jax.random.uniform(kw, (fan_in, fan_out), jnp.float32, -bound, bound)
        b = jax.random.uniform(kb, (1, fan_out), jnp.float32, -bound, bound)
        return w, b

    w1, b1 = linear(k[0], k[1], INPUT_DIM, H1)
    w2, b2 = linear(k[2], k[3], H1, H2)
    w3, b3 = linear(k[4], k[5], H2, OUT)          # (32, 1)
    # Store layer-3 weight as a lane-dense (1, 32) row for the in-kernel VPU reduce.
    return {"w1": w1, "b1": b1, "w2": w2, "b2": b2, "w3": w3.T, "b3": b3}


def _reference(x, p):
    """Pure-JAX f32 reference."""
    h1 = jnp.maximum(x @ p["w1"] + p["b1"], 0.0)
    h2 = jnp.maximum(h1 @ p["w2"] + p["b2"], 0.0)
    return jnp.sum(h2 * p["w3"], axis=-1, keepdims=True) + p["b3"]


if __name__ == "__main__":
    key = jax.random.PRNGKey(0)
    kx, kp = jax.random.split(key)
    params = init_params(kp)

    # Cases: tiny batch (< 8 rows, block == full dim), exact sublane multiple,
    # odd batch in a single block, and odd batch forced onto a multi-step grid
    # with a masked partial last block.
    cases = [(4, DEFAULT_TILE_B), (8, DEFAULT_TILE_B), (300, DEFAULT_TILE_B), (300, 128)]
    for B, tb in cases:
        x = jax.random.normal(jax.random.fold_in(kx, 17 * B + tb),
                              (B, INPUT_DIM), jnp.float32)
        out = jax.block_until_ready(regression_nn_forward(x, params, tile_b=tb))
        ref = _reference(x, params)
        assert out.shape == (B, OUT), out.shape
        err = float(jnp.max(jnp.abs(out - ref)))
        assert err < 1e-2, err

    print("KERNEL_OK")
</pallas_src>

<mosaic_0001>
module attributes {stable_mosaic.version = 11 : i64} {
  func.func @_mlp_kernel(%arg0: i32, %arg1: memref<4x10xf32, #tpu.memory_space<vmem>>, %arg2: memref<10x64xf32, #tpu.memory_space<vmem>>, %arg3: memref<1x64xf32, #tpu.memory_space<vmem>>, %arg4: memref<64x32xf32, #tpu.memory_space<vmem>>, %arg5: memref<1x32xf32, #tpu.memory_space<vmem>>, %arg6: memref<1x32xf32, #tpu.memory_space<vmem>>, %arg7: memref<1x1xf32, #tpu.memory_space<vmem>>, %arg8: memref<4x1xf32, #tpu.memory_space<vmem>>) attributes {dimension_semantics = [#tpu.dimension_semantics<parallel>], iteration_bounds = array<i64: 1>, scalar_prefetch = 0 : i64, scratch_operands = 0 : i64, tpu.core_type = #tpu.core_type<tc>, window_params = [{transform_indices = @transform_0, window_bounds = array<i64: 4, 10>}, {pipeline_mode = #tpu.pipeline_mode<synchronous>, transform_indices = @transform_1, window_bounds = array<i64: 10, 64>}, {pipeline_mode = #tpu.pipeline_mode<synchronous>, transform_indices = @transform_2, window_bounds = array<i64: 1, 64>}, {pipeline_mode = #tpu.pipeline_mode<synchronous>, transform_indices = @transform_3, window_bounds = array<i64: 64, 32>}, {pipeline_mode = #tpu.pipeline_mode<synchronous>, transform_indices = @transform_4, window_bounds = array<i64: 1, 32>}, {pipeline_mode = #tpu.pipeline_mode<synchronous>, transform_indices = @transform_5, window_bounds = array<i64: 1, 32>}, {pipeline_mode = #tpu.pipeline_mode<synchronous>, transform_indices = @transform_6, window_bounds = array<i64: 1, 1>}, {transform_indices = @transform_7, window_bounds = array<i64: 4, 1>}]} {
    %c0 = arith.constant 0 : index
    %c0_0 = arith.constant 0 : index
    %0 = vector.load %arg1[%c0, %c0_0] : memref<4x10xf32, #tpu.memory_space<vmem>>, vector<4x10xf32>
    %c0_1 = arith.constant 0 : index
    %c0_2 = arith.constant 0 : index
    %1 = vector.load %arg2[%c0_1, %c0_2] : memref<10x64xf32, #tpu.memory_space<vmem>>, vector<10x64xf32>
    %cst = arith.constant dense<0.000000e+00> : vector<4x64xf32>
    %2 = tpu.matmul %0, %1, %cst {dimension_numbers = #tpu.dot_dimension_numbers<[1], [0], [0], [1], [0, 0, 1, 1], [], []>} : vector<4x10xf32>, vector<10x64xf32>, vector<4x64xf32> -> vector<4x64xf32>
    %c0_3 = arith.constant 0 : index
    %c0_4 = arith.constant 0 : index
    %3 = vector.load %arg3[%c0_3, %c0_4] : memref<1x64xf32, #tpu.memory_space<vmem>>, vector<1x64xf32>
    %4 = vector.broadcast %3 : vector<1x64xf32> to vector<4x64xf32>
    %5 = arith.addf %2, %4 : vector<4x64xf32>
    %cst_5 = arith.constant 0.000000e+00 : f32
    %6 = vector.broadcast %cst_5 : f32 to vector<4x64xf32>
    %7 = arith.maximumf %5, %6 : vector<4x64xf32>
    %c0_6 = arith.constant 0 : index
    %c0_7 = arith.constant 0 : index
    %8 = vector.load %arg4[%c0_6, %c0_7] : memref<64x32xf32, #tpu.memory_space<vmem>>, vector<64x32xf32>
    %cst_8 = arith.constant dense<0.000000e+00> : vector<4x32xf32>
    %9 = tpu.matmul %7, %8, %cst_8 {dimension_numbers = #tpu.dot_dimension_numbers<[1], [0], [0], [1], [0, 0, 1, 1], [], []>} : vector<4x64xf32>, vector<64x32xf32>, vector<4x32xf32> -> vector<4x32xf32>
    %c0_9 = arith.constant 0 : index
    %c0_10 = arith.constant 0 : index
    %10 = vector.load %arg5[%c0_9, %c0_10] : memref<1x32xf32, #tpu.memory_space<vmem>>, vector<1x32xf32>
    %11 = vector.broadcast %10 : vector<1x32xf32> to vector<4x32xf32>
    %12 = arith.addf %9, %11 : vector<4x32xf32>
    %cst_11 = arith.constant 0.000000e+00 : f32
    %13 = vector.broadcast %cst_11 : f32 to vector<4x32xf32>
    %14 = arith.maximumf %12, %13 : vector<4x32xf32>
    %c0_12 = arith.constant 0 : index
    %c0_13 = arith.constant 0 : index
    %15 = vector.load %arg6[%c0_12, %c0_13] : memref<1x32xf32, #tpu.memory_space<vmem>>, vector<1x32xf32>
    %16 = vector.broadcast %15 : vector<1x32xf32> to vector<4x32xf32>
    %17 = arith.mulf %14, %16 : vector<4x32xf32>
    %cst_14 = arith.constant dense<0.000000e+00> : vector<4xf32>
    %18 = vector.multi_reduction <add>, %17, %cst_14 [1] : vector<4x32xf32> to vector<4xf32>
    %19 = vector.shape_cast %18 : vector<4xf32> to vector<4x1xf32>
    %c0_15 = arith.constant 0 : index
    %c0_16 = arith.constant 0 : index
    %20 = vector.load %arg7[%c0_15, %c0_16] : memref<1x1xf32, #tpu.memory_space<vmem>>, vector<1x1xf32>
    %21 = vector.broadcast %20 : vector<1x1xf32> to vector<4x1xf32>
    %22 = arith.addf %19, %21 : vector<4x1xf32>
    %c0_17 = arith.constant 0 : index
    %c0_18 = arith.constant 0 : index
    %23 = vector.load %arg8[%c0_17, %c0_18] : memref<4x1xf32, #tpu.memory_space<vmem>>, vector<4x1xf32>
    tpu.vector_store %arg8[%c0_17, %c0_18], %22 {strides = array<i32>} : memref<4x1xf32, #tpu.memory_space<vmem>>, vector<4x1xf32>,
    return
  }
  func.func @transform_0(%arg0: i32) -> (i32, i32) {
    %c0_i32 = arith.constant 0 : i32
    %c0_i32_0 = arith.constant 0 : i32
    return %arg0, %c0_i32 : i32, i32
  }
  func.func @transform_1(%arg0: i32) -> (i32, i32) {
    %c0_i32 = arith.constant 0 : i32
    %c0_i32_0 = arith.constant 0 : i32
    %c0_i32_1 = arith.constant 0 : i32
    return %c0_i32, %c0_i32_0 : i32, i32
  }
  func.func @transform_2(%arg0: i32) -> (i32, i32) {
    %c0_i32 = arith.constant 0 : i32
    %c0_i32_0 = arith.constant 0 : i32
    %c0_i32_1 = arith.constant 0 : i32
    return %c0_i32, %c0_i32_0 : i32, i32
  }
  func.func @transform_3(%arg0: i32) -> (i32, i32) {
    %c0_i32 = arith.constant 0 : i32
    %c0_i32_0 = arith.constant 0 : i32
    %c0_i32_1 = arith.constant 0 : i32
    return %c0_i32, %c0_i32_0 : i32, i32
  }
  func.func @transform_4(%arg0: i32) -> (i32, i32) {
    %c0_i32 = arith.constant 0 : i32
    %c0_i32_0 = arith.constant 0 : i32
    %c0_i32_1 = arith.constant 0 : i32
    return %c0_i32, %c0_i32_0 : i32, i32
  }
  func.func @transform_5(%arg0: i32) -> (i32, i32) {
    %c0_i32 = arith.constant 0 : i32
    %c0_i32_0 = arith.constant 0 : i32
    %c0_i32_1 = arith.constant 0 : i32
    return %c0_i32, %c0_i32_0 : i32, i32
  }
  func.func @transform_6(%arg0: i32) -> (i32, i32) {
    %c0_i32 = arith.constant 0 : i32
    %c0_i32_0 = arith.constant 0 : i32
    %c0_i32_1 = arith.constant 0 : i32
    return %c0_i32, %c0_i32_0 : i32, i32
  }
  func.func @transform_7(%arg0: i32) -> (i32, i32) {
    %c0_i32 = arith.constant 0 : i32
    %c0_i32_0 = arith.constant 0 : i32
    return %arg0, %c0_i32 : i32, i32
  }
}

</mosaic_0001>

<bundles_post_ra>
// kernel: tpu_custom_call.1
= control target key start
LH: loop header
LB: loop body
LE: loop exit
PB: predicated region body
PF: predicated region fallthrough
CT: control target
= control target key end

     0   :  { %vm42_vm0 = vcmask 1041408   ;;  %v298_v0 = vmov 0.0|0.0   ;;  %vm299_vm1 = vmmov 1   ;;  %vm300_vm3 = vmmov 0   ;;  %s390_s1 = inlined_call_operand.vmem [shape: f32[10,64], index: 1, kind: input, shape index: {}]   ;;  %s391_s3 = inlined_call_operand.vmem [shape: f32[64,32], index: 3, kind: input, shape index: {}]   ;;  %s392_s0 = inlined_call_operand.vmem [shape: f32[4,10], index: 0, kind: input, shape index: {}]   ;;  %s393_s2 = inlined_call_operand.vmem [shape: f32[1,64], index: 2, kind: input, shape index: {}]   ;;  %s394_s6 = inlined_call_operand.<no memory space> [shape: f32[1,1], index: 6, kind: input, shape index: {}]   ;;  %s395_s4 = inlined_call_operand.vmem [shape: f32[1,32], index: 4, kind: input, shape index: {}]   ;;  %s396_s5 = inlined_call_operand.vmem [shape: f32[1,32], index: 5, kind: input, shape index: {}]   ;;  %s397_s7 = inlined_call_operand.vmem [shape: f32[4,1], index: 7, kind: output, shape index: {}]  }
   0x1   :  { %278 = vmatprep.subr.bf16.mxu0 %v298_v0  ;;  %v29_v1 = vld [vmem:[%s390_s1] sm:$0xff]  ;;  %v30_v2 = vld [vmem:[%s390_s1 + $0x8] sm:$0x3]  ;;  %vm280_vm2 = vmpackc.low %vm42_vm0, %vm299_vm1  ;;  %282 = vmatprep.subr.bf16.mxu1 %v298_v0  ;;  %v301_v4 = vmov 0.0   ;;  %vm38_vm4 = vcmask 80896   ;;  %vm132_vm5 = vcmask 523264   ;;  %v12_v23 = vstv %s394_s6 }
   0x2   :  { %v279_v3 = vpack.c.bf16 %v30_v2, %v29_v1  ;;  %256 = vmatprep.mubr.msk.f32.mxu0 %vm300_vm3, %v301_v4  ;;  %v117_v5 = vld [vmem:[%s391_s3] sm:$0xff]  ;;  %v118_v6 = vld [vmem:[%s391_s3 + $0x8] sm:$0xff]  ;;  %275 = vmatprep.mubr.msk.f32.mxu1 %vm300_vm3, %v301_v4  ;;  %v119_v8 = vld [vmem:[%s391_s3 + $0x10] sm:$0xff]  ;;  %13 = vst [vmem:[#allocation2] sm:$0x1] %v12_v23  ;;  %vm215_vm6 = vcmask 257024  }
   0x3   :  { %v283_v7 = vpack.c.bf16 %v118_v6, %v117_v5  ;;  %v120_v9 = vld [vmem:[%s391_s3 + $0x18] sm:$0xff]  ;;  %v28_v10 = vld [vmem:[%s392_s0] sm:$0xf]  ;;  %v122_v13 = vld [vmem:[%s391_s3 + $0x28] sm:$0xff]  ;;  %vm227_vm7 = vcmask 3072  }
   0x4   :  { %281 = vmatpush3.bf16.msk.msra.mxu0 %vm280_vm2, %v279_v3  ;;  %v286_v11 = vpack.c.bf16 %v120_v9, %v119_v8  ;;  %v121_v12 = vld [vmem:[%s391_s3 + $0x20] sm:$0xff]  ;;  %v123_v15 = vld [vmem:[%s391_s3 + $0x30] sm:$0xff]  ;;  %v124_v16 = vld [vmem:[%s391_s3 + $0x38] sm:$0xff] }
   0x5   :  { %284 = vmatpush3.bf16.msra.mxu1 %v283_v7  ;;  %v289_v14 = vpack.c.bf16 %v122_v13, %v121_v12  ;;  %v292_v17 = vpack.c.bf16 %v124_v16, %v123_v15  ;;  %v233_v18 = vld [vmem:[%s393_s2] ss:$0 sm:$0xff] }
   0x6   :  { %285 = vmatprep.subr.bf16.mxu1 %v298_v0  ;;  %v236_v24 = vld [vmem:[%s395_s4] ss:$0 sm:$0xff] }
   0x7   :  { %257 = vmatmul.mubr.msk.f32.vlgmr.msra.gmra.mrb[0].mxu0 %vm38_vm4, %v28_v10  ;;  %v238_v28 = vld [vmem:[%s396_s5] ss:$0 sm:$0xff] }
   0x9   :  { %287 = vmatpush3.bf16.msra.mxu1 %v286_v11  ;;  %v239_v32 = vld [vmem:[#allocation2] ss:$0 sm:$0xff] }
   0xa   :  { %288 = vmatprep.subr.bf16.mxu1 %v298_v0 }
   0xd   :  { %290 = vmatpush3.bf16.msra.mxu1 %v289_v14 }
   0xe   :  { %291 = vmatprep.subr.bf16.mxu1 %v298_v0 }
  0x11   :  { %293 = vmatpush3.bf16.msra.mxu1 %v292_v17 }
  0xda   :  { %v112_v19 = vpop.f32.mrb[0].mxu0 }
  0xdb   :  { %v113_v20 = vadd.f32 %v233_v18, %v112_v19  ;;  %v258_v21 = vpop.f32.mrb[1].mxu0 }
  0xdd   :  { %v116_v22 = vmax.f32 %v113_v20, 0.0 }
  0xdf   :  { %276 = vmatmul.mubr.msk.f32.vlgmr.msra.gmra.mrb[0].mxu1 %vm132_vm5, %v116_v22 }
 0x1b2   :  { %v202_v25 = vpop.f32.mrb[0].mxu1 }
 0x1b3   :  { %v203_v26 = vadd.f32 %v236_v24, %v202_v25  ;;  %v277_v27 = vpop.f32.mrb[1].mxu1 }
 0x1b5   :  { %v206_v29 = vmax.f32 %v203_v26, 0.0 }
 0x1b7   :  { %v214_v30 = vmul.f32 %v238_v28, %v206_v29 }
 0x1b9   :  { %v216_v31 = vsel %vm215_vm6, %v214_v30, 0.0 }
 0x1ba   :  { %217 = vadd.xlane.f32.xlu0 %v216_v31 }
 0x247   :  { %v218_v33 = vpop.xlane.xlu0 %217 }
 0x248   :  { %v226_v34 = vadd.f32 %v239_v32, %v218_v33 }
 0x24a   :  { %228 = vst.msk [vmem:[%s397_s7] sm:$0xf] %vm227_vm7, %v226_v34 }

</bundles_post_ra>
